<compile_context>
chip_gen: v6e
topology: v6e:2x2x1
jax: 0.10.0
libtpu: 0.0.40
codegen_flags: <defaults>
</compile_context>

<pallas_src>
import functools

import jax
import jax.numpy as jnp
from jax.experimental import pallas as pl
from jax.experimental.pallas import tpu as pltpu


# ----------------------------------------------------------------------------
# helpers
# ----------------------------------------------------------------------------
def _nan_to_num(x, nan_val):
    finfo = jnp.finfo(jnp.float32)
    x = jnp.where(jnp.isnan(x), jnp.float32(nan_val), x)
    x = jnp.where(x == jnp.inf, finfo.max, x)
    x = jnp.where(x == -jnp.inf, finfo.min, x)
    return x


def _pick_tile_n(n, cap=2048):
    """Batch tile: whole batch if it fits, else the largest power-of-two tile
    (partial last block handled by Pallas output masking)."""
    if n <= cap:
        return n
    for t in (2048, 1024, 512, 256, 128):
        if t <= cap and n % t == 0:
            return t
    return cap


# ----------------------------------------------------------------------------
# fused kernel: all V views (block-diagonal MLP) + Evidence_DC fusion
# ----------------------------------------------------------------------------
def _tdr_fused_kernel(x_ref, w1_ref, b1_ref, w2_ref, b2_ref, out_ref,
                      *, num_views, num_classes, beta):
    V, C = num_views, num_classes

    # ---- per-view evidence collectors, merged into two MXU passes ----
    x = x_ref[...]                                            # bf16 [T, D_total]
    h = jnp.dot(x, w1_ref[...], preferred_element_type=jnp.float32) + b1_ref[...]
    # Sigmoid via a single EUP tanh push: sigmoid(t) == 0.5*(tanh(t/2)+1)
    h = 0.5 * (jnp.tanh(0.5 * h) + 1.0)                       # f32 [T, V*H]
    z = jnp.dot(h.astype(jnp.bfloat16), w2_ref[...],
                preferred_element_type=jnp.float32) + b2_ref[...]
    # Softplus with PyTorch's linear-above-threshold=20 behavior
    sp = jnp.where(z > 20.0, z, jnp.log1p(jnp.exp(jnp.minimum(z, 20.0))))
    ev = sp * sp                                              # f32 [T, V*C]
    out_ref[:, 0:V * C] = ev.astype(out_ref.dtype)

    # ---- Evidence_DC fusion (same math as the PyTorch reference, f32) ----
    E = [_nan_to_num(ev[:, v * C:(v + 1) * C], 0.0) for v in range(V)]

    # consensus evidence: seeded with E[0], then min over pairwise maxima
    E_con = E[0]
    for i in range(V - 1):
        for j in range(i + 1, V):
            E_con = jnp.minimum(jnp.maximum(E[i], E[j]), E_con)

    # mean per-view divergence (streamed, no big temporaries)
    E_div = jnp.abs(E[0] - E_con)
    for v in range(1, V):
        E_div = E_div + jnp.abs(E[v] - E_con)
    E_div = E_div / jnp.float32(V)

    alpha_con = E_con + 1.0
    S_con = jnp.sum(alpha_con, axis=-1, keepdims=True)
    b_con = E_con / S_con
    S_b = jnp.sum(b_con, axis=-1, keepdims=True)

    beta_f = float(beta)
    if beta_f == 2.0:
        b_con2 = b_con * b_con
    elif beta_f.is_integer() and 1.0 <= beta_f <= 4.0:
        b_con2 = b_con
        for _ in range(int(beta_f) - 1):
            b_con2 = b_con2 * b_con
    else:
        b_con2 = jnp.power(b_con, jnp.float32(beta_f))

    S_b2 = jnp.sum(b_con2, axis=-1, keepdims=True)
    b_cona = b_con2 * (S_b / S_b2)         # 0/0 -> nan, rescued below as in torch
    E_con2 = b_cona * S_con * jnp.float32(V)

    E_a = E_con2 + E_div

    ev_a = _nan_to_num(E_a + 1.0, 1.0) - 1.0
    ev_c = _nan_to_num(E_con2 + 1.0, 1.0) - 1.0
    ev_d = _nan_to_num(E_div + 1.0, 1.0) - 1.0

    out_ref[:, V * C:(V + 1) * C] = ev_a.astype(out_ref.dtype)
    out_ref[:, (V + 1) * C:(V + 2) * C] = ev_c.astype(out_ref.dtype)
    out_ref[:, (V + 2) * C:(V + 3) * C] = ev_d.astype(out_ref.dtype)


# ----------------------------------------------------------------------------
# parameter construction / packing
# ----------------------------------------------------------------------------
def init_params(key, dims, num_classes, hidden=64):
    """Deterministic per-view params. Weights stored as [in, out] (= W.T of torch)."""
    params = []
    for d in dims:
        din = d[0]
        k1, k2, k3, k4, key = jax.random.split(key, 5)
        s1 = 1.0 / jnp.sqrt(jnp.float32(din))
        s2 = 1.0 / jnp.sqrt(jnp.float32(hidden))
        w1 = jax.random.uniform(k1, (din, hidden), jnp.float32, -s1, s1)
        b1 = jax.random.uniform(k2, (1, hidden), jnp.float32, -s1, s1)
        w2 = jax.random.uniform(k3, (hidden, num_classes), jnp.float32, -s2, s2)
        b2 = jax.random.uniform(k4, (1, num_classes), jnp.float32, -s2, s2)
        params.append((w1, b1, w2, b2))
    return params


def pack_params(params, dims, num_classes, hidden=64):
    """Build block-diagonal merged weights once (no per-view hidden padding).
    Weight matrices cast to bf16 for the MXU; biases stay f32."""
    V = len(params)
    D = [d[0] for d in dims]
    D_total = sum(D)
    H, C = hidden, num_classes

    w1bd = jnp.zeros((D_total, V * H), jnp.float32)
    b1 = jnp.zeros((1, V * H), jnp.float32)
    w2bd = jnp.zeros((V * H, V * C), jnp.float32)
    b2 = jnp.zeros((1, V * C), jnp.float32)

    off = 0
    for v, (w1v, b1v, w2v, b2v) in enumerate(params):
        dv = w1v.shape[0]
        w1bd = w1bd.at[off:off + dv, v * H:(v + 1) * H].set(w1v)
        b1 = b1.at[:, v * H:(v + 1) * H].set(b1v)
        w2bd = w2bd.at[v * H:(v + 1) * H, v * C:(v + 1) * C].set(w2v)
        b2 = b2.at[:, v * C:(v + 1) * C].set(b2v)
        off += dv
    return w1bd.astype(jnp.bfloat16), b1, w2bd.astype(jnp.bfloat16), b2


# ----------------------------------------------------------------------------
# TDR_IMV forward (single fused pallas_call)
# ----------------------------------------------------------------------------
def tdr_imv_forward(X, y, global_step, beta, packed_params, num_classes):
    # y, global_step are unused in the reference forward (loss not returned here).
    del y, global_step
    V = len(X)
    C = num_classes
    w1bd, b1, w2bd, b2 = packed_params

    xcat = jnp.concatenate([x.astype(jnp.float32) for x in X],
                           axis=-1).astype(jnp.bfloat16)
    N, D_total = xcat.shape
    VH = w1bd.shape[1]
    OUTW = (V + 3) * C

    tile_n = _pick_tile_n(N)
    grid = (pl.cdiv(N, tile_n),)

    kernel = functools.partial(
        _tdr_fused_kernel, num_views=V, num_classes=C, beta=float(beta))

    packed_out = pl.pallas_call(
        kernel,
        out_shape=jax.ShapeDtypeStruct((N, OUTW), jnp.float32),
        grid=grid,
        in_specs=[
            pl.BlockSpec((tile_n, D_total), lambda i: (i, 0)),   # x tile, pipelined
            pl.BlockSpec((D_total, VH), lambda i: (0, 0)),       # weights resident
            pl.BlockSpec((1, VH), lambda i: (0, 0)),
            pl.BlockSpec((VH, V * C), lambda i: (0, 0)),
            pl.BlockSpec((1, V * C), lambda i: (0, 0)),
        ],
        out_specs=pl.BlockSpec((tile_n, OUTW), lambda i: (i, 0)),
        compiler_params=pltpu.CompilerParams(
            dimension_semantics=("parallel",),        # shards batch across TCs on v7x
            vmem_limit_bytes=32 * 1024 * 1024,        # safe on v5e/v6e/v7x
        ),
    )(xcat, w1bd, b1, w2bd, b2)

    evidences = [packed_out[:, v * C:(v + 1) * C] for v in range(V)]
    evidence_a = packed_out[:, V * C:(V + 1) * C]
    evidence_con = packed_out[:, (V + 1) * C:(V + 2) * C]
    evidence_div = packed_out[:, (V + 2) * C:(V + 3) * C]
    return evidences, evidence_a, evidence_con, evidence_div


# ----------------------------------------------------------------------------
# pure-JAX reference (for a light numerical sanity check, full f32)
# ----------------------------------------------------------------------------
def _reference_forward(X, beta, params):
    evs = []
    for x, (w1, b1, w2, b2) in zip(X, params):
        h = jax.nn.sigmoid(x @ w1 + b1)
        z = h @ w2 + b2
        sp = jnp.where(z > 20.0, z, jnp.log1p(jnp.exp(jnp.minimum(z, 20.0))))
        evs.append(sp * sp)
    V = len(evs)
    E = [jnp.nan_to_num(e, nan=0.0) for e in evs]
    E_con = E[0]
    for i in range(V - 1):
        for j in range(i + 1, V):
            E_con = jnp.minimum(jnp.maximum(E[i], E[j]), E_con)
    E_div = sum(jnp.abs(E[v] - E_con) for v in range(V)) / V
    alpha_con = E_con + 1.0
    S_con = jnp.sum(alpha_con, axis=1, keepdims=True)
    b_con = E_con / S_con
    S_b = jnp.sum(b_con, axis=1, keepdims=True)
    b_con2 = jnp.power(b_con, beta)
    S_b2 = jnp.sum(b_con2, axis=1, keepdims=True)
    E_con2 = b_con2 * (S_b / S_b2) * S_con * V
    E_a = E_con2 + E_div
    ev_a = jnp.nan_to_num(E_a + 1.0, nan=1.0) - 1.0
    ev_c = jnp.nan_to_num(E_con2 + 1.0, nan=1.0) - 1.0
    ev_d = jnp.nan_to_num(E_div + 1.0, nan=1.0) - 1.0
    return evs, ev_a, ev_c, ev_d


if __name__ == "__main__":
    num_views = 3
    dims = [[20], [12], [32]]
    num_classes = 5
    batch = 8
    beta = 2.0

    key = jax.random.PRNGKey(0)
    kx, kp = jax.random.split(key)
    xkeys = jax.random.split(kx, num_views)
    X = [jax.random.normal(xkeys[v], (batch, dims[v][0]), jnp.float32)
         for v in range(num_views)]
    y = jnp.zeros((batch,), jnp.int32)   # unused by forward
    global_step = 1                      # unused by forward

    params = init_params(kp, dims, num_classes)
    packed = pack_params(params, dims, num_classes)

    evidences, ev_a, ev_con, ev_div = tdr_imv_forward(
        X, y, global_step, beta, packed, num_classes)
    jax.block_until_ready((evidences, ev_a, ev_con, ev_div))

    assert ev_a.shape == (batch, num_classes)
    assert ev_con.shape == (batch, num_classes)
    assert ev_div.shape == (batch, num_classes)
    assert all(e.shape == (batch, num_classes) for e in evidences)

    # numerical check vs pure-f32 JAX reference (tolerance sized for bf16 MXU inputs)
    r_evs, r_a, r_c, r_d = _reference_forward(X, beta, params)
    for e, r in zip(evidences, r_evs):
        assert jnp.allclose(e, r, rtol=2e-2, atol=2e-2)
    assert jnp.allclose(ev_a, r_a, rtol=2e-2, atol=2e-2)
    assert jnp.allclose(ev_con, r_c, rtol=2e-2, atol=2e-2)
    assert jnp.allclose(ev_div, r_d, rtol=2e-2, atol=2e-2)

    print("KERNEL_OK")
</pallas_src>

<mosaic_0001>
module attributes {stable_mosaic.version = 11 : i64} {
  func.func @_tdr_fused_kernel(%arg0: i32, %arg1: memref<8x64xbf16, #tpu.memory_space<vmem>>, %arg2: memref<64x192xbf16, #tpu.memory_space<vmem>>, %arg3: memref<1x192xf32, #tpu.memory_space<vmem>>, %arg4: memref<192x15xbf16, #tpu.memory_space<vmem>>, %arg5: memref<1x15xf32, #tpu.memory_space<vmem>>, %arg6: memref<8x30xf32, #tpu.memory_space<vmem>>) attributes {dimension_semantics = [#tpu.dimension_semantics<parallel>], iteration_bounds = array<i64: 1>, scalar_prefetch = 0 : i64, scratch_operands = 0 : i64, tpu.core_type = #tpu.core_type<tc>, window_params = [{transform_indices = @transform_0, window_bounds = array<i64: 8, 64>}, {pipeline_mode = #tpu.pipeline_mode<synchronous>, transform_indices = @transform_1, window_bounds = array<i64: 64, 192>}, {pipeline_mode = #tpu.pipeline_mode<synchronous>, transform_indices = @transform_2, window_bounds = array<i64: 1, 192>}, {pipeline_mode = #tpu.pipeline_mode<synchronous>, transform_indices = @transform_3, window_bounds = array<i64: 192, 15>}, {pipeline_mode = #tpu.pipeline_mode<synchronous>, transform_indices = @transform_4, window_bounds = array<i64: 1, 15>}, {transform_indices = @transform_5, window_bounds = array<i64: 8, 30>}]} {
    %c0 = arith.constant 0 : index
    %c0_0 = arith.constant 0 : index
    %0 = vector.load %arg1[%c0, %c0_0] : memref<8x64xbf16, #tpu.memory_space<vmem>>, vector<8x64xbf16>
    %c0_1 = arith.constant 0 : index
    %c0_2 = arith.constant 0 : index
    %1 = vector.load %arg2[%c0_1, %c0_2] : memref<64x192xbf16, #tpu.memory_space<vmem>>, vector<64x192xbf16>
    %cst = arith.constant dense<0.000000e+00> : vector<8x192xf32>
    %2 = tpu.matmul %0, %1, %cst {dimension_numbers = #tpu.dot_dimension_numbers<[1], [0], [0], [1], [0, 0, 1, 1], [], []>} : vector<8x64xbf16>, vector<64x192xbf16>, vector<8x192xf32> -> vector<8x192xf32>
    %c0_3 = arith.constant 0 : index
    %c0_4 = arith.constant 0 : index
    %3 = vector.load %arg3[%c0_3, %c0_4] : memref<1x192xf32, #tpu.memory_space<vmem>>, vector<1x192xf32>
    %4 = vector.broadcast %3 : vector<1x192xf32> to vector<8x192xf32>
    %5 = arith.addf %2, %4 : vector<8x192xf32>
    %cst_5 = arith.constant 5.000000e-01 : f32
    %6 = vector.broadcast %cst_5 : f32 to vector<8x192xf32>
    %7 = arith.mulf %6, %5 : vector<8x192xf32>
    %8 = math.tanh %7 : vector<8x192xf32>
    %cst_6 = arith.constant 1.000000e+00 : f32
    %9 = vector.broadcast %cst_6 : f32 to vector<8x192xf32>
    %10 = arith.addf %8, %9 : vector<8x192xf32>
    %cst_7 = arith.constant 5.000000e-01 : f32
    %11 = vector.broadcast %cst_7 : f32 to vector<8x192xf32>
    %12 = arith.mulf %11, %10 : vector<8x192xf32>
    %13 = arith.truncf %12 : vector<8x192xf32> to vector<8x192xbf16>
    %c0_8 = arith.constant 0 : index
    %c0_9 = arith.constant 0 : index
    %14 = vector.load %arg4[%c0_8, %c0_9] : memref<192x15xbf16, #tpu.memory_space<vmem>>, vector<192x15xbf16>
    %cst_10 = arith.constant dense<0.000000e+00> : vector<8x15xf32>
    %15 = tpu.matmul %13, %14, %cst_10 {dimension_numbers = #tpu.dot_dimension_numbers<[1], [0], [0], [1], [0, 0, 1, 1], [], []>} : vector<8x192xbf16>, vector<192x15xbf16>, vector<8x15xf32> -> vector<8x15xf32>
    %c0_11 = arith.constant 0 : index
    %c0_12 = arith.constant 0 : index
    %16 = vector.load %arg5[%c0_11, %c0_12] : memref<1x15xf32, #tpu.memory_space<vmem>>, vector<1x15xf32>
    %17 = vector.broadcast %16 : vector<1x15xf32> to vector<8x15xf32>
    %18 = arith.addf %15, %17 : vector<8x15xf32>
    %cst_13 = arith.constant 2.000000e+01 : f32
    %19 = vector.broadcast %cst_13 : f32 to vector<8x15xf32>
    %20 = arith.cmpf ogt, %18, %19 : vector<8x15xf32>
    %cst_14 = arith.constant 2.000000e+01 : f32
    %21 = vector.broadcast %cst_14 : f32 to vector<8x15xf32>
    %22 = arith.minimumf %18, %21 : vector<8x15xf32>
    %23 = math.exp %22 : vector<8x15xf32>
    %24 = math.log1p %23 : vector<8x15xf32>
    %25 = arith.select %20, %18, %24 : vector<8x15xi1>, vector<8x15xf32>
    %26 = arith.mulf %25, %25 : vector<8x15xf32>
    %c0_15 = arith.constant 0 : index
    %c0_16 = arith.constant 0 : index
    %27 = vector.load %arg6[%c0_15, %c0_16] : memref<8x30xf32, #tpu.memory_space<vmem>>, vector<8x15xf32>
    tpu.vector_store %arg6[%c0_15, %c0_16], %26 {strides = array<i32>} : memref<8x30xf32, #tpu.memory_space<vmem>>, vector<8x15xf32>,
    %28 = vector.extract_strided_slice %26 {offsets = [0, 0], sizes = [8, 5], strides = [1, 1]} : vector<8x15xf32> to vector<8x5xf32>
    %29 = arith.cmpf one, %28, %28 : vector<8x5xf32>
    %cst_17 = arith.constant 0.000000e+00 : f32
    %30 = vector.broadcast %cst_17 : f32 to vector<8x5xf32>
    %31 = arith.select %29, %30, %28 : vector<8x5xi1>, vector<8x5xf32>
    %cst_18 = arith.constant 0x7F800000 : f32
    %32 = vector.broadcast %cst_18 : f32 to vector<8x5xf32>
    %33 = arith.cmpf oeq, %31, %32 : vector<8x5xf32>
    %cst_19 = arith.constant 3.40282347E+38 : f32
    %34 = vector.broadcast %cst_19 : f32 to vector<8x5xf32>
    %35 = arith.select %33, %34, %31 : vector<8x5xi1>, vector<8x5xf32>
    %cst_20 = arith.constant 0xFF800000 : f32
    %36 = vector.broadcast %cst_20 : f32 to vector<8x5xf32>
    %37 = arith.cmpf oeq, %35, %36 : vector<8x5xf32>
    %cst_21 = arith.constant -3.40282347E+38 : f32
    %38 = vector.broadcast %cst_21 : f32 to vector<8x5xf32>
    %39 = arith.select %37, %38, %35 : vector<8x5xi1>, vector<8x5xf32>
    %40 = vector.extract_strided_slice %26 {offsets = [0, 5], sizes = [8, 5], strides = [1, 1]} : vector<8x15xf32> to vector<8x5xf32>
    %41 = arith.cmpf one, %40, %40 : vector<8x5xf32>
    %cst_22 = arith.constant 0.000000e+00 : f32
    %42 = vector.broadcast %cst_22 : f32 to vector<8x5xf32>
    %43 = arith.select %41, %42, %40 : vector<8x5xi1>, vector<8x5xf32>
    %cst_23 = arith.constant 0x7F800000 : f32
    %44 = vector.broadcast %cst_23 : f32 to vector<8x5xf32>
    %45 = arith.cmpf oeq, %43, %44 : vector<8x5xf32>
    %cst_24 = arith.constant 3.40282347E+38 : f32
    %46 = vector.broadcast %cst_24 : f32 to vector<8x5xf32>
    %47 = arith.select %45, %46, %43 : vector<8x5xi1>, vector<8x5xf32>
    %cst_25 = arith.constant 0xFF800000 : f32
    %48 = vector.broadcast %cst_25 : f32 to vector<8x5xf32>
    %49 = arith.cmpf oeq, %47, %48 : vector<8x5xf32>
    %cst_26 = arith.constant -3.40282347E+38 : f32
    %50 = vector.broadcast %cst_26 : f32 to vector<8x5xf32>
    %51 = arith.select %49, %50, %47 : vector<8x5xi1>, vector<8x5xf32>
    %52 = vector.extract_strided_slice %26 {offsets = [0, 10], sizes = [8, 5], strides = [1, 1]} : vector<8x15xf32> to vector<8x5xf32>
    %53 = arith.cmpf one, %52, %52 : vector<8x5xf32>
    %cst_27 = arith.constant 0.000000e+00 : f32
    %54 = vector.broadcast %cst_27 : f32 to vector<8x5xf32>
    %55 = arith.select %53, %54, %52 : vector<8x5xi1>, vector<8x5xf32>
    %cst_28 = arith.constant 0x7F800000 : f32
    %56 = vector.broadcast %cst_28 : f32 to vector<8x5xf32>
    %57 = arith.cmpf oeq, %55, %56 : vector<8x5xf32>
    %cst_29 = arith.constant 3.40282347E+38 : f32
    %58 = vector.broadcast %cst_29 : f32 to vector<8x5xf32>
    %59 = arith.select %57, %58, %55 : vector<8x5xi1>, vector<8x5xf32>
    %cst_30 = arith.constant 0xFF800000 : f32
    %60 = vector.broadcast %cst_30 : f32 to vector<8x5xf32>
    %61 = arith.cmpf oeq, %59, %60 : vector<8x5xf32>
    %cst_31 = arith.constant -3.40282347E+38 : f32
    %62 = vector.broadcast %cst_31 : f32 to vector<8x5xf32>
    %63 = arith.select %61, %62, %59 : vector<8x5xi1>, vector<8x5xf32>
    %64 = arith.maximumf %39, %51 : vector<8x5xf32>
    %65 = arith.minimumf %64, %39 : vector<8x5xf32>
    %66 = arith.maximumf %39, %63 : vector<8x5xf32>
    %67 = arith.minimumf %66, %65 : vector<8x5xf32>
    %68 = arith.maximumf %51, %63 : vector<8x5xf32>
    %69 = arith.minimumf %68, %67 : vector<8x5xf32>
    %70 = arith.subf %39, %69 : vector<8x5xf32>
    %71 = math.absf %70 : vector<8x5xf32>
    %72 = arith.subf %51, %69 : vector<8x5xf32>
    %73 = math.absf %72 : vector<8x5xf32>
    %74 = arith.addf %71, %73 : vector<8x5xf32>
    %75 = arith.subf %63, %69 : vector<8x5xf32>
    %76 = math.absf %75 : vector<8x5xf32>
    %77 = arith.addf %74, %76 : vector<8x5xf32>
    %cst_32 = arith.constant 3.000000e+00 : f32
    %78 = vector.broadcast %cst_32 : f32 to vector<8x5xf32>
    %79 = arith.divf %77, %78 : vector<8x5xf32>
    %cst_33 = arith.constant 1.000000e+00 : f32
    %80 = vector.broadcast %cst_33 : f32 to vector<8x5xf32>
    %81 = arith.addf %69, %80 : vector<8x5xf32>
    %cst_34 = arith.constant dense<0.000000e+00> : vector<8xf32>
    %82 = vector.multi_reduction <add>, %81, %cst_34 [1] : vector<8x5xf32> to vector<8xf32>
    %83 = vector.shape_cast %82 : vector<8xf32> to vector<8x1xf32>
    %84 = vector.broadcast %83 : vector<8x1xf32> to vector<8x5xf32>
    %85 = arith.divf %69, %84 : vector<8x5xf32>
    %cst_35 = arith.constant dense<0.000000e+00> : vector<8xf32>
    %86 = vector.multi_reduction <add>, %85, %cst_35 [1] : vector<8x5xf32> to vector<8xf32>
    %87 = vector.shape_cast %86 : vector<8xf32> to vector<8x1xf32>
    %88 = arith.mulf %85, %85 : vector<8x5xf32>
    %cst_36 = arith.constant dense<0.000000e+00> : vector<8xf32>
    %89 = vector.multi_reduction <add>, %88, %cst_36 [1] : vector<8x5xf32> to vector<8xf32>
    %90 = vector.shape_cast %89 : vector<8xf32> to vector<8x1xf32>
    %91 = arith.divf %87, %90 : vector<8x1xf32>
    %92 = vector.broadcast %91 : vector<8x1xf32> to vector<8x5xf32>
    %93 = arith.mulf %88, %92 : vector<8x5xf32>
    %94 = vector.broadcast %83 : vector<8x1xf32> to vector<8x5xf32>
    %95 = arith.mulf %93, %94 : vector<8x5xf32>
    %cst_37 = arith.constant 3.000000e+00 : f32
    %96 = vector.broadcast %cst_37 : f32 to vector<8x5xf32>
    %97 = arith.mulf %95, %96 : vector<8x5xf32>
    %98 = arith.addf %97, %79 : vector<8x5xf32>
    %cst_38 = arith.constant 1.000000e+00 : f32
    %99 = vector.broadcast %cst_38 : f32 to vector<8x5xf32>
    %100 = arith.addf %98, %99 : vector<8x5xf32>
    %101 = arith.cmpf one, %100, %100 : vector<8x5xf32>
    %cst_39 = arith.constant 1.000000e+00 : f32
    %102 = vector.broadcast %cst_39 : f32 to vector<8x5xf32>
    %103 = arith.select %101, %102, %100 : vector<8x5xi1>, vector<8x5xf32>
    %cst_40 = arith.constant 0x7F800000 : f32
    %104 = vector.broadcast %cst_40 : f32 to vector<8x5xf32>
    %105 = arith.cmpf oeq, %103, %104 : vector<8x5xf32>
    %cst_41 = arith.constant 3.40282347E+38 : f32
    %106 = vector.broadcast %cst_41 : f32 to vector<8x5xf32>
    %107 = arith.select %105, %106, %103 : vector<8x5xi1>, vector<8x5xf32>
    %cst_42 = arith.constant 0xFF800000 : f32
    %108 = vector.broadcast %cst_42 : f32 to vector<8x5xf32>
    %109 = arith.cmpf oeq, %107, %108 : vector<8x5xf32>
    %cst_43 = arith.constant -3.40282347E+38 : f32
    %110 = vector.broadcast %cst_43 : f32 to vector<8x5xf32>
    %111 = arith.select %109, %110, %107 : vector<8x5xi1>, vector<8x5xf32>
    %cst_44 = arith.constant 1.000000e+00 : f32
    %112 = vector.broadcast %cst_44 : f32 to vector<8x5xf32>
    %113 = arith.subf %111, %112 : vector<8x5xf32>
    %cst_45 = arith.constant 1.000000e+00 : f32
    %114 = vector.broadcast %cst_45 : f32 to vector<8x5xf32>
    %115 = arith.addf %97, %114 : vector<8x5xf32>
    %116 = arith.cmpf one, %115, %115 : vector<8x5xf32>
    %cst_46 = arith.constant 1.000000e+00 : f32
    %117 = vector.broadcast %cst_46 : f32 to vector<8x5xf32>
    %118 = arith.select %116, %117, %115 : vector<8x5xi1>, vector<8x5xf32>
    %cst_47 = arith.constant 0x7F800000 : f32
    %119 = vector.broadcast %cst_47 : f32 to vector<8x5xf32>
    %120 = arith.cmpf oeq, %118, %119 : vector<8x5xf32>
    %cst_48 = arith.constant 3.40282347E+38 : f32
    %121 = vector.broadcast %cst_48 : f32 to vector<8x5xf32>
    %122 = arith.select %120, %121, %118 : vector<8x5xi1>, vector<8x5xf32>
    %cst_49 = arith.constant 0xFF800000 : f32
    %123 = vector.broadcast %cst_49 : f32 to vector<8x5xf32>
    %124 = arith.cmpf oeq, %122, %123 : vector<8x5xf32>
    %cst_50 = arith.constant -3.40282347E+38 : f32
    %125 = vector.broadcast %cst_50 : f32 to vector<8x5xf32>
    %126 = arith.select %124, %125, %122 : vector<8x5xi1>, vector<8x5xf32>
    %cst_51 = arith.constant 1.000000e+00 : f32
    %127 = vector.broadcast %cst_51 : f32 to vector<8x5xf32>
    %128 = arith.subf %126, %127 : vector<8x5xf32>
    %cst_52 = arith.constant 1.000000e+00 : f32
    %129 = vector.broadcast %cst_52 : f32 to vector<8x5xf32>
    %130 = arith.addf %79, %129 : vector<8x5xf32>
    %131 = arith.cmpf one, %130, %130 : vector<8x5xf32>
    %cst_53 = arith.constant 1.000000e+00 : f32
    %132 = vector.broadcast %cst_53 : f32 to vector<8x5xf32>
    %133 = arith.select %131, %132, %130 : vector<8x5xi1>, vector<8x5xf32>
    %cst_54 = arith.constant 0x7F800000 : f32
    %134 = vector.broadcast %cst_54 : f32 to vector<8x5xf32>
    %135 = arith.cmpf oeq, %133, %134 : vector<8x5xf32>
    %cst_55 = arith.constant 3.40282347E+38 : f32
    %136 = vector.broadcast %cst_55 : f32 to vector<8x5xf32>
    %137 = arith.select %135, %136, %133 : vector<8x5xi1>, vector<8x5xf32>
    %cst_56 = arith.constant 0xFF800000 : f32
    %138 = vector.broadcast %cst_56 : f32 to vector<8x5xf32>
    %139 = arith.cmpf oeq, %137, %138 : vector<8x5xf32>
    %cst_57 = arith.constant -3.40282347E+38 : f32
    %140 = vector.broadcast %cst_57 : f32 to vector<8x5xf32>
    %141 = arith.select %139, %140, %137 : vector<8x5xi1>, vector<8x5xf32>
    %cst_58 = arith.constant 1.000000e+00 : f32
    %142 = vector.broadcast %cst_58 : f32 to vector<8x5xf32>
    %143 = arith.subf %141, %142 : vector<8x5xf32>
    %c0_59 = arith.constant 0 : index
    %c15 = arith.constant 15 : index
    %144 = vector.load %arg6[%c0_59, %c15] : memref<8x30xf32, #tpu.memory_space<vmem>>, vector<8x5xf32>
    tpu.vector_store %arg6[%c0_59, %c15], %113 {strides = array<i32>} : memref<8x30xf32, #tpu.memory_space<vmem>>, vector<8x5xf32>,
    %c0_60 = arith.constant 0 : index
    %c20 = arith.constant 20 : index
    %145 = vector.load %arg6[%c0_60, %c20] : memref<8x30xf32, #tpu.memory_space<vmem>>, vector<8x5xf32>
    tpu.vector_store %arg6[%c0_60, %c20], %128 {strides = array<i32>} : memref<8x30xf32, #tpu.memory_space<vmem>>, vector<8x5xf32>,
    %c0_61 = arith.constant 0 : index
    %c25 = arith.constant 25 : index
    %146 = vector.load %arg6[%c0_61, %c25] : memref<8x30xf32, #tpu.memory_space<vmem>>, vector<8x5xf32>
    tpu.vector_store %arg6[%c0_61, %c25], %143 {strides = array<i32>} : memref<8x30xf32, #tpu.memory_space<vmem>>, vector<8x5xf32>,
    return
  }
  func.func @transform_0(%arg0: i32) -> (i32, i32) {
    %c0_i32 = arith.constant 0 : i32
    %c0_i32_0 = arith.constant 0 : i32
    return %arg0, %c0_i32 : i32, i32
  }
  func.func @transform_1(%arg0: i32) -> (i32, i32) {
    %c0_i32 = arith.constant 0 : i32
    %c0_i32_0 = arith.constant 0 : i32
    %c0_i32_1 = arith.constant 0 : i32
    return %c0_i32, %c0_i32_0 : i32, i32
  }
  func.func @transform_2(%arg0: i32) -> (i32, i32) {
    %c0_i32 = arith.constant 0 : i32
    %c0_i32_0 = arith.constant 0 : i32
    %c0_i32_1 = arith.constant 0 : i32
    return %c0_i32, %c0_i32_0 : i32, i32
  }
  func.func @transform_3(%arg0: i32) -> (i32, i32) {
    %c0_i32 = arith.constant 0 : i32
    %c0_i32_0 = arith.constant 0 : i32
    %c0_i32_1 = arith.constant 0 : i32
    return %c0_i32, %c0_i32_0 : i32, i32
  }
  func.func @transform_4(%arg0: i32) -> (i32, i32) {
    %c0_i32 = arith.constant 0 : i32
    %c0_i32_0 = arith.constant 0 : i32
    %c0_i32_1 = arith.constant 0 : i32
    return %c0_i32, %c0_i32_0 : i32, i32
  }
  func.func @transform_5(%arg0: i32) -> (i32, i32) {
    %c0_i32 = arith.constant 0 : i32
    %c0_i32_0 = arith.constant 0 : i32
    return %arg0, %c0_i32 : i32, i32
  }
}

</mosaic_0001>

<bundles_post_ra>
// kernel: tpu_custom_call.1
= control target key start
LH: loop header
LB: loop body
LE: loop exit
PB: predicated region body
PF: predicated region fallthrough
CT: control target
= control target key end

     0   :  { %v532_v2 = vmov 0   ;;  %vm83_vm0 = vcmask 523264   ;;  %s658_s0 = inlined_call_operand.vmem [shape: bf16[8,64], index: 0, kind: input, shape index: {}]   ;;  %s659_s1 = inlined_call_operand.vmem [shape: bf16[64,192], index: 1, kind: input, shape index: {}]   ;;  %s660_s2 = inlined_call_operand.vmem [shape: f32[1,192], index: 2, kind: input, shape index: {}]   ;;  %s661_s3 = inlined_call_operand.vmem [shape: bf16[192,15], index: 3, kind: input, shape index: {}]   ;;  %s662_s4 = inlined_call_operand.vmem [shape: f32[1,15], index: 4, kind: input, shape index: {}]   ;;  %s663_s5 = inlined_call_operand.hbm [shape: f32[8,30], index: 5, kind: output, shape index: {}]  }
   0x1   :  { %v474_v0 = vld [vmem:[%s659_s1 + $0x34] ss:$8 sps:$4 sm:$0xff]   ;;  %v476_v1 = vld [vmem:[%s659_s1 + $0x30] ss:$8 sps:$4 sm:$0xff]   ;;  %119 = vmatprep.mubr.bf16.mxu0 %v532_v2  ;;  %244 = vmatprep.subr.bf16.mxu1 %v532_v2  ;;  %v477_v3 = vld [vmem:[%s659_s1 + $0x24] ss:$8 sps:$4 sm:$0xff]  }
   0x2   :  { %95 = vmatprep.subr.bf16.mxu0 %v474_v0  ;;  %v479_v4 = vld [vmem:[%s659_s1 + $0x20] ss:$8 sps:$4 sm:$0xff]   ;;  %v480_v5 = vld [vmem:[%s659_s1 + $0x14] ss:$8 sps:$4 sm:$0xff]   ;;  %v482_v6 = vld [vmem:[%s659_s1 + $0x10] ss:$8 sps:$4 sm:$0xff]  }
   0x3   :  { %96 = vmatpush1.bf16.msra.mxu0 %v476_v1  ;;  %v486_v7 = vld [vmem:[%s661_s3 + $0x38] sm:$0xff]   ;;  %v483_v8 = vld [vmem:[%s659_s1 + $0x4] ss:$8 sps:$4 sm:$0xff]   ;;  %v487_v9 = vld [vmem:[%s661_s3 + $0x30] sm:$0xff]  }
   0x4   :  { %97 = vmatprep.subr.bf16.mxu0 %v477_v3  ;;  %245 = vmatpush1.bf16.msra.mxu1 %v486_v7  ;;  %v485_v10 = vld [vmem:[%s659_s1] ss:$8 sps:$4 sm:$0xff]  }
   0x5   :  { %246 = vmatprep.subr.bf16.mxu1 %v532_v2  ;;  %v488_v11 = vld [vmem:[%s661_s3 + $0x28] sm:$0xff]   ;;  %v22_v12 = vld [vmem:[%s658_s0] sm:$0xf] }
   0x7   :  { %98 = vmatpush1.bf16.msra.mxu0 %v479_v4 }
   0x8   :  { %99 = vmatprep.subr.bf16.mxu0 %v480_v5  ;;  %247 = vmatpush1.bf16.msra.mxu1 %v487_v9 }
   0x9   :  { %248 = vmatprep.subr.bf16.mxu1 %v532_v2 }
   0xb   :  { %100 = vmatpush1.bf16.msra.mxu0 %v482_v6 }
   0xc   :  { %101 = vmatprep.subr.bf16.mxu0 %v483_v8 }
   0xf   :  { %102 = vmatpush1.bf16.msra.mxu0 %v485_v10 }
  0x10   :  { %10 = vsyncpa [#allocation3], 0  ;;  %249 = vmatpush1.bf16.msra.mxu1 %v488_v11  ;;  %v489_v13 = vld [vmem:[%s661_s3 + $0x20] sm:$0xff]   ;;  %v490_v14 = vld [vmem:[%s661_s3 + $0x18] sm:$0xff]   ;;  %v33_v22 = vlaneseq  ;;  %vm299_vm3 = vcmask 121856   ;;  %s534_s10 = smov 118  }
  0x11   :  { %250 = vmatprep.subr.bf16.mxu1 %v532_v2  ;;  %v491_v15 = vld [vmem:[%s661_s3 + $0x10] sm:$0xff]   ;;  %v492_v16 = vld [vmem:[%s661_s3 + $0x8] sm:$0xff]   ;;  %v493_v17 = vld [vmem:[%s661_s3] sm:$0xff]   ;;  %s535_s11 = smov 5   ;;  %vm353_vm7 = vcmask 39936   ;;  %s536_s12 = smov 15  }
  0x12   :  { %448 = vmatmul.mubr.msk.bf16.vlgmr.msra.gmra.mxu0 %vm83_vm0, %v22_v12  ;;  %v494_v18 = vld [vmem:[%s661_s3 + $0x58] sm:$0xff]   ;;  %v495_v19 = vld [vmem:[%s661_s3 + $0x50] sm:$0xff]   ;;  %v496_v20 = vld [vmem:[%s661_s3 + $0x48] sm:$0xff]   ;;  %v34_v23 = vshrl.u32 %v33_v22, 7  ;;  %s537_s13 = smov 10   ;;  %s538_s14 = smov 25  }
  0x13   :  { %v497_v21 = vld [vmem:[%s661_s3 + $0x40] sm:$0xff]   ;;  %s539_s15 = smov [#allocation2]  }
  0x14   :  { %251 = vmatpush1.bf16.msra.mxu1 %v489_v13  ;;  %v35_v24 = vsub.s32 0, %v34_v23  ;;  %v31_v25 = vld [vmem:[%s660_s2] sm:$0x3]  ;;  %v39_v26 = vsub.s32 1, %v34_v23  ;;  %s432_s16 = sshll.u32 %s539_s15, 4  ;;  %s433_s16 = int_to_ptr.vmem [resolvable:$true] %s432_s16 }
  0x15   :  { %252 = vmatprep.subr.bf16.mxu1 %v532_v2  ;;  %v449_v45 = vld [vmem:[%s662_s4] ss:$0 sm:$0xff]  ;;  %s533_s4 = smov 123   ;;  %s510_s17 = scalar_lea.vmem %s433_s16, 128 }
  0x16   :  { %v36_v27 = vrot.slane %v31_v25, %v35_v24  ;;  %v40_v28 = vrot.slane %v31_v25, %v39_v26  ;;  %p511_p0 = scmp.ne.s32.totalorder %s433_s16, %s510_s17  ;;  %p515_p1 = scmp.lt.s32.totalorder %s433_s16, %s433_s16 }
  0x17   :  { %p516_p2 = scmp.lt.s32.totalorder %s510_s17, %s510_s17 }
  0x18   :  { %253 = vmatpush1.bf16.msra.mxu1 %v490_v14 }
  0x19   :  { %254 = vmatprep.subr.bf16.mxu1 %v532_v2  ;;  %p517_p3 = por %p516_p2, %p515_p1 }
  0x1b   :  { %p518_p4 = pnand %p517_p3, %p511_p0 }
  0x1c   :  { %255 = vmatpush1.bf16.msra.mxu1 %v491_v15 }
  0x1d   :  { %256 = vmatprep.subr.bf16.mxu1 %v532_v2 }
  0x20   :  { %257 = vmatpush1.bf16.msra.mxu1 %v492_v16 }
  0x21   :  { %258 = vmatprep.subr.bf16.mxu1 %v532_v2 }
  0x24   :  { %259 = vmatpush1.bf16.msra.mxu1 %v493_v17 }
  0x25   :  { %268 = vmatprep.subr.bf16.mxu1 %v532_v2 }
  0x28   :  { %269 = vmatpush2.bf16.msra.mxu1 %v494_v18 }
  0x29   :  { %270 = vmatprep.subr.bf16.mxu1 %v532_v2 }
  0x2c   :  { %271 = vmatpush2.bf16.msra.mxu1 %v495_v19 }
  0x2d   :  { %272 = vmatprep.subr.bf16.mxu1 %v532_v2 }
  0x30   :  { %273 = vmatpush2.bf16.msra.mxu1 %v496_v20 }
  0x31   :  { %274 = vmatprep.subr.bf16.mxu1 %v532_v2 }
  0x34   :  { %275 = vmatpush2.bf16.msra.mxu1 %v497_v21 }
  0xd2   :  { %v121_v29 = vpop.f32.mrf.mxu0 }
  0xd3   :  { %v122_v30 = vadd.f32 %v121_v29, %v36_v27 }
  0xd4   :  { %v123_v31 = vpop.f32.mrf.mxu0 }
  0xd5   :  { %v128_v32 = vmul.f32 0.5, %v122_v30  ;;  %v124_v33 = vadd.f32 %v123_v31, %v40_v28 }
  0xd6   :  { %v125_v34 = vpop.f32.mrf.mxu0 }
  0xd7   :  { %498 = vtanh.f32 %v128_v32  ;;  %v129_v35 = vmul.f32 0.5, %v124_v33 }
  0xd8   :  { %v126_v36 = vpop.f32.mrf.mxu0 }
  0xd9   :  { %500 = vtanh.f32 %v129_v35 }
  0xe4   :  { %v499_v37 = vpop.eup %498 }
  0xe5   :  { %v132_v38 = vadd.f32 1.0, %v499_v37 }
  0xe6   :  { %v501_v39 = vpop.eup %500 }
  0xe7   :  { %v133_v40 = vadd.f32 1.0, %v501_v39  ;;  %v134_v41 = vmul.f32 0.5, %v132_v38 }
  0xe9   :  { %v135_v42 = vmul.f32 0.5, %v133_v40  ;;  %v136_v44 = vpack.c.bf16 %v134_v41, %v134_v41 }
  0xeb   :  { %v137_v43 = vpack.c.bf16 %v135_v42, %v135_v42 }
  0xed   :  { %462 = vmatprep.mubr.msk.bf16.mxu1 %vm83_vm0, %v137_v43 }
  0xee   :  { %277 = vmatmul.mubr.bf16.vlgmr.msra.gmra.mxu1 %v136_v44 }
 0x1ae   :  { %v278_v46 = vpop.f32.mrf.mxu1 }
 0x1af   :  { %v279_v47 = vadd.f32 %v449_v45, %v278_v46 }
 0x1b0   :  { %v280_v48 = vpop.f32.mrf.mxu1 }
 0x1b1   :  { %v285_v49 = vmin.f32 %v279_v47, 20.0  ;;  %vm284_vm2 = vcmp.gt.f32.partialorder %v279_v47, 20.0 }
 0x1b2   :  { %v281_v50 = vpop.f32.mrf.mxu1 }
 0x1b3   :  { %v286_v51 = vmul.f32 1.442695, %v285_v49 }
 0x1b4   :  { %v282_v52 = vpop.f32.mrf.mxu1 }
 0x1b5   :  { %502 = vpow2.f32 %v286_v51 }
 0x1c2   :  { %v503_v53 = vpop.eup %502 }
 0x1c3   :  { %v288_v54 = vadd.f32 1.0, %v503_v53  ;;  %v291_v55 = vmul.f32 -0.5, %v503_v53  ;;  %v294_v57 = vand.u32 2147483647, %v503_v53 }
 0x1c5   :  { %504 = vlog2.f32 %v288_v54  ;;  %v292_v56 = vadd.f32 1.0, %v291_v55  ;;  %vm295_vm1 = vcmp.lt.f32.partialorder %v294_v57, 0.0004427343 }
 0x1c7   :  { %v293_v60 = vmul.f32 %v503_v53, %v292_v56 }
 0x1d2   :  { %v505_v58 = vpop.eup %504 }
 0x1d3   :  { %v290_v59 = vmul.f32 0.6931472, %v505_v58 }
 0x1d5   :  { %v296_v61 = vsel %vm295_vm1, %v293_v60, %v290_v59  ;;  %vm412_vm1 = vcmask 162936  }
 0x1d6   :  { %v297_v62 = vsel %vm284_vm2, %v279_v47, %v296_v61  ;;  %vm418_vm2 = vcmask 203936  }
 0x1d7   :  { %v298_v63 = vmul.f32 %v297_v62, %v297_v62 }
 0x1d9   :  { %vm301_vm4 = vcmp.ne.f32.partialorder %v298_v63, %v298_v63  ;;  %300 = vst.msk [vmem:[#allocation2] sm:$0xff] %vm299_vm3, %v298_v63  ;;  %vm424_vm3 = vcmask 244936  }
 0x1da   :  { %v302_v0 = vsel %vm301_vm4, 0.0, %v298_v63 }
 0x1db   :  { %vm303_vm5 = vcmp.eq.f32.partialorder %v302_v0, inf }
 0x1dc   :  { %v304_v1 = vsel %vm303_vm5, 3.4028235e+38, %v302_v0 }
 0x1dd   :  { %vm305_vm6 = vcmp.eq.f32.partialorder %v304_v1, -inf }
 0x1de   :  { %v306_v2 = vsel %vm305_vm6, -3.4028235e+38, %v304_v1 }
 0x1df   :  { %308 = vrot.lane.b32.xlu0 %v306_v2, %s533_s4 }
 0x1e3   :  { %313 = vrot.lane.b32.xlu0 %v306_v2, %s534_s10 }
 0x251   :  { %v309_v3 = vpop.permute.xlu0 %308 }
 0x252   :  { %v311_v4 = vmax.f32 %v306_v2, %v309_v3 }
 0x254   :  { %v312_v6 = vmin.f32 %v311_v4, %v306_v2 }
 0x255   :  { %v314_v5 = vpop.permute.xlu0 %313 }
 0x256   :  { %v316_v7 = vmax.f32 %v306_v2, %v314_v5 }
 0x258   :  { %v317_v8 = vmin.f32 %v316_v7, %v312_v6 }
 0x25a   :  { %319 = vrot.lane.b32.xlu1 %v317_v8, %s535_s11 }
 0x2cc   :  { %v320_v9 = vpop.permute.xlu1 %319 }
 0x2cd   :  { %v322_v10 = vmin.f32 %v311_v4, %v320_v9 }
 0x2cf   :  { %v348_v11 = vadd.f32 1.0, %v322_v10  ;;  %v329_v18 = vsub.f32 %v306_v2, %v322_v10 }
 0x2d1   :  { %350 = vrot.lane.b32.xlu1 %v348_v11, %s533_s4  ;;  %v330_v21 = vand.u32 2147483647, %v329_v18 }
 0x2d5   :  { %336 = vrot.lane.b32.xlu1 %v322_v10, %s535_s11 }
 0x343   :  { %v351_v12 = vpop.permute.xlu1 %350 }
 0x344   :  { %v354_v13 = vsel %vm353_vm7, %v351_v12, 0.0 }
 0x345   :  { %355 = vadd.xlane.f32.xlu0 %v354_v13 }
 0x347   :  { %v337_v19 = vpop.permute.xlu1 %336 }
 0x348   :  { %v339_v20 = vsub.f32 %v306_v2, %v337_v19 }
 0x34a   :  { %v340_v22 = vand.u32 2147483647, %v339_v20 }
 0x3ce   :  { %v356_v14 = vpop.xlane.xlu0 %355 }
 0x3cf   :  { %506 = vrcp.f32 %v356_v14 }
 0x3dc   :  { %v507_v15 = vpop.eup %506 }
 0x3dd   :  { %v358_v16 = vmul.f32 %v507_v15, %v322_v10 }
 0x3df   :  { %v366_v17 = vmul.f32 %v358_v16, %v358_v16 }
 0x3e1   :  { %368 = vrot.lane.b32.xlu1 %v366_v17, %s533_s4 }
 0x3e5   :  { %360 = vrot.lane.b32.xlu1 %v358_v16, %s533_s4 }
 0x3e9   :  { %324 = vrot.lane.b32.xlu1 %v322_v10, %s533_s4 }
 0x3ed   :  { %332 = vrot.lane.b32.xlu1 %v330_v21, %s533_s4 }
 0x3f1   :  { %342 = vrot.lane.b32.xlu1 %v340_v22, %s534_s10 }
 0x453   :  { %v369_v23 = vpop.permute.xlu1 %368 }
 0x454   :  { %v371_v24 = vsel %vm353_vm7, %v369_v23, 0.0 }
 0x455   :  { %372 = vadd.xlane.f32.xlu1 %v371_v24 }
 0x457   :  { %v361_v25 = vpop.permute.xlu1 %360 }
 0x458   :  { %v363_v26 = vsel %vm353_vm7, %v361_v25, 0.0 }
 0x459   :  { %364 = vadd.xlane.f32.xlu0 %v363_v26 }
 0x45b   :  { %v325_v27 = vpop.permute.xlu1 %324 }
 0x45c   :  { %v327_v28 = vsub.f32 %v306_v2, %v325_v27 }
 0x45e   :  { %v328_v30 = vand.u32 2147483647, %v327_v28 }
 0x45f   :  { %v333_v29 = vpop.permute.xlu1 %332 }
 0x460   :  { %v335_v32 = vadd.f32 %v333_v29, %v328_v30 }
 0x463   :  { %v343_v31 = vpop.permute.xlu1 %342 }
 0x464   :  { %v345_v33 = vadd.f32 %v343_v31, %v335_v32 }
 0x466   :  { %v347_v34 = vmul.f32 0.33333334, %v345_v33 }
 0x468   :  { %v400_v38 = vadd.f32 1.0, %v347_v34 }
 0x46a   :  { %vm401_vm8 = vcmp.ne.f32.partialorder %v400_v38, %v400_v38 }
 0x46b   :  { %v402_v43 = vsel %vm401_vm8, 1.0, %v400_v38 }
 0x46c   :  { %vm403_vm9 = vcmp.eq.f32.partialorder %v402_v43, inf }
 0x46d   :  { %v404_v51 = vsel %vm403_vm9, 3.4028235e+38, %v402_v43 }
 0x46e   :  { %vm405_vm0 = vcmp.eq.f32.partialorder %v404_v51, -inf }
 0x46f   :  { %380 = vrot.lane.b32.xlu0 %v347_v34, %s535_s11  ;;  %v406_v57 = vsel %vm405_vm0, -3.4028235e+38, %v404_v51 }
 0x470   :  { %v465_v58 = vadd.f32 -1.0, %v406_v57 }
 0x4de   :  { %v373_v35 = vpop.xlane.xlu1 %372 }
 0x4df   :  { %508 = vrcp.f32 %v373_v35 }
 0x4e2   :  { %v365_v37 = vpop.xlane.xlu0 %364 }
 0x4e6   :  { %v381_v44 = vpop.permute.xlu0 %380 }
 0x4ec   :  { %v509_v36 = vpop.eup %508 }
 0x4ed   :  { %v375_v39 = vmul.f32 %v509_v36, %v365_v37 }
 0x4ef   :  { %v376_v40 = vmul.f32 %v375_v39, %v366_v17 }
 0x4f1   :  { %v377_v41 = vmul.f32 %v376_v40, %v356_v14 }
 0x4f3   :  { %v378_v42 = vmul.f32 3.0, %v377_v41 }
 0x4f5   :  { %v383_v45 = vadd.f32 %v381_v44, %v378_v42  ;;  %v392_v46 = vadd.f32 1.0, %v378_v42 }
 0x4f7   :  { %v384_v47 = vadd.f32 1.0, %v383_v45  ;;  %vm393_vm10 = vcmp.ne.f32.partialorder %v392_v46, %v392_v46 }
 0x4f8   :  { %v394_v48 = vsel %vm393_vm10, 1.0, %v392_v46 }
 0x4f9   :  { %vm385_vm11 = vcmp.ne.f32.partialorder %v384_v47, %v384_v47  ;;  %vm395_vm12 = vcmp.eq.f32.partialorder %v394_v48, inf }
 0x4fa   :  { %v386_v49 = vsel %vm385_vm11, 1.0, %v384_v47  ;;  %v396_v50 = vsel %vm395_vm12, 3.4028235e+38, %v394_v48 }
 0x4fb   :  { %vm387_vm13 = vcmp.eq.f32.partialorder %v386_v49, inf  ;;  %vm397_vm14 = vcmp.eq.f32.partialorder %v396_v50, -inf }
 0x4fc   :  { %v388_v52 = vsel %vm387_vm13, 3.4028235e+38, %v386_v49  ;;  %v398_v53 = vsel %vm397_vm14, -3.4028235e+38, %v396_v50 }
 0x4fd   :  { %vm389_vm15 = vcmp.eq.f32.partialorder %v388_v52, -inf  ;;  %v464_v54 = vadd.f32 -1.0, %v398_v53 }
 0x4fe   :  { %v390_v55 = vsel %vm389_vm15, -3.4028235e+38, %v388_v52 }
 0x4ff   :  { %415 = vrot.lane.b32.xlu1 %v464_v54, %s536_s12  ;;  %v463_v56 = vadd.f32 -1.0, %v390_v55 }
 0x501   :  { %409 = vrot.lane.b32.xlu0 %v463_v56, %s537_s13 }
 0x505   :  { %421 = vrot.lane.b32.xlu0 %v465_v58, %s538_s14 }
 0x571   :  { %v416_v60 = vpop.permute.xlu1 %415 }
 0x573   :  { %v410_v59 = vpop.permute.xlu0 %409 }
 0x574   :  { %413 = vst.msk [vmem:[#allocation2] sm:$0xff] %vm412_vm1, %v410_v59 }
 0x575   :  { %419 = vst.msk [vmem:[#allocation2] sm:$0xff] %vm418_vm2, %v416_v60 }
 0x577   :  { %v422_v61 = vpop.permute.xlu0 %421 }
 0x578   :  { %425 = vst.msk [vmem:[#allocation2] sm:$0xff] %vm424_vm3, %v422_v61 }
 0x579   :  { %521 = shalt.err (!%p518_p4)
}
 0x57a   :  { %435 = dma.vmem_to_hbm [thread:$0]  %s433_s16, 128, %s663_s5, [#allocation3]  }
 0x57b   :  { %530 = dma.done.wait [#allocation3], 128  }
 0x57c   :  { %531 = vsyncadd [#allocation3], 4294967168 }
 0x57d   :  { %439 = vsyncpa [#allocation3], 1 }

</bundles_post_ra>
